<compile_context>
chip_gen: v7x
topology: tpu7x:2x2x1
jax: 0.10.0
libtpu: 0.0.40
codegen_flags: <defaults>
</compile_context>

<pallas_src>
import math

import jax
import jax.numpy as jnp
import numpy as np
from jax.experimental import pallas as pl
from jax.experimental.pallas import tpu as pltpu


def pe_add_kernel(x_ref, pe_ref, o_ref):
    # x_ref : (block_s, B, D)   pe_ref : (block_s, 1, D)   o_ref : (block_s, B, D)
    x = x_ref[...]
    pe = pe_ref[...]
    o_ref[...] = (x + pe).astype(o_ref.dtype)   # broadcast over batch (sublane axis)


def make_pe_table(max_len, d_model, dtype=jnp.float32):
    """Builds the PositionalEncoding buffer exactly like the PyTorch __init__."""
    position = np.arange(max_len, dtype=np.float32)[:, None]                  # (L, 1)
    div_term = np.exp(np.arange(0, d_model, 2, dtype=np.float32)
                      * (-math.log(10000.0) / d_model))                       # (D/2,)
    pe = np.zeros((max_len, d_model), dtype=np.float32)
    pe[:, 0::2] = np.sin(position * div_term)
    pe[:, 1::2] = np.cos(position * div_term)
    return jnp.asarray(pe[:, None, :], dtype=dtype)                           # (L, 1, D)


def positional_encoding(x, pe, *, block_s=None):
    """x: (S, B, D) seq-first; pe: (max_len, 1, D). Returns x + pe[:S] (eval-mode)."""
    S, B, D = x.shape
    assert pe.shape[1] == 1 and pe.shape[2] == D and pe.shape[0] >= S

    if block_s is None:
        block_s = S if S <= 1024 else 512       # toy shapes: single grid step

    grid = (pl.cdiv(S, block_s),)

    return pl.pallas_call(
        pe_add_kernel,
        out_shape=jax.ShapeDtypeStruct((S, B, D), x.dtype),
        grid=grid,
        in_specs=[
            pl.BlockSpec((block_s, B, D), lambda i: (i, 0, 0)),   # x seq-tile
            pl.BlockSpec((block_s, 1, D), lambda i: (i, 0, 0)),   # pe[:S] seq-tile
        ],
        out_specs=pl.BlockSpec((block_s, B, D), lambda i: (i, 0, 0)),
        compiler_params=pltpu.CompilerParams(dimension_semantics=("parallel",)),
    )(x, pe)


if __name__ == "__main__":
    # Shapes consistent with the module: d_model = 128 (from the source file),
    # small seq / batch: S=8, B=2.
    S, B, D = 8, 2, 128
    MAX_LEN = 5000

    key = jax.random.PRNGKey(0)
    x = jax.random.normal(key, (S, B, D), jnp.float32)
    pe = make_pe_table(MAX_LEN, D)

    out = positional_encoding(x, pe)
    out = jax.block_until_ready(out)

    # Pure-JAX reference mirroring the PyTorch forward (eval mode).
    ref = x + pe[:S]
    assert out.shape == (S, B, D)
    np.testing.assert_allclose(np.asarray(out), np.asarray(ref), rtol=1e-6, atol=1e-6)
    print("KERNEL_OK")
</pallas_src>

<mosaic_0001>
module attributes {stable_mosaic.version = 11 : i64} {
  func.func @pe_add_kernel(%arg0: i32, %arg1: memref<8x2x128xf32, #tpu.memory_space<vmem>>, %arg2: memref<8x1x128xf32, #tpu.memory_space<vmem>>, %arg3: memref<8x2x128xf32, #tpu.memory_space<vmem>>) attributes {dimension_semantics = [#tpu.dimension_semantics<parallel>], iteration_bounds = array<i64: 1>, scalar_prefetch = 0 : i64, scratch_operands = 0 : i64, tpu.core_type = #tpu.core_type<tc>, window_params = [{transform_indices = @transform_0, window_bounds = array<i64: 8, 2, 128>}, {transform_indices = @transform_1, window_bounds = array<i64: 8, 1, 128>}, {transform_indices = @transform_2, window_bounds = array<i64: 8, 2, 128>}]} {
    %c0 = arith.constant 0 : index
    %c0_0 = arith.constant 0 : index
    %c0_1 = arith.constant 0 : index
    %0 = vector.load %arg1[%c0, %c0_0, %c0_1] : memref<8x2x128xf32, #tpu.memory_space<vmem>>, vector<8x2x128xf32>
    %c0_2 = arith.constant 0 : index
    %c0_3 = arith.constant 0 : index
    %c0_4 = arith.constant 0 : index
    %1 = vector.load %arg2[%c0_2, %c0_3, %c0_4] : memref<8x1x128xf32, #tpu.memory_space<vmem>>, vector<8x1x128xf32>
    %2 = vector.broadcast %1 : vector<8x1x128xf32> to vector<8x2x128xf32>
    %3 = arith.addf %0, %2 : vector<8x2x128xf32>
    %c0_5 = arith.constant 0 : index
    %c0_6 = arith.constant 0 : index
    %c0_7 = arith.constant 0 : index
    %4 = vector.load %arg3[%c0_5, %c0_6, %c0_7] : memref<8x2x128xf32, #tpu.memory_space<vmem>>, vector<8x2x128xf32>
    tpu.vector_store %arg3[%c0_5, %c0_6, %c0_7], %3 {strides = array<i32>} : memref<8x2x128xf32, #tpu.memory_space<vmem>>, vector<8x2x128xf32>,
    return
  }
  func.func @transform_0(%arg0: i32) -> (i32, i32, i32) {
    %c0_i32 = arith.constant 0 : i32
    %c0_i32_0 = arith.constant 0 : i32
    %c0_i32_1 = arith.constant 0 : i32
    return %arg0, %c0_i32, %c0_i32_0 : i32, i32, i32
  }
  func.func @transform_1(%arg0: i32) -> (i32, i32, i32) {
    %c0_i32 = arith.constant 0 : i32
    %c0_i32_0 = arith.constant 0 : i32
    %c0_i32_1 = arith.constant 0 : i32
    return %arg0, %c0_i32, %c0_i32_0 : i32, i32, i32
  }
  func.func @transform_2(%arg0: i32) -> (i32, i32, i32) {
    %c0_i32 = arith.constant 0 : i32
    %c0_i32_0 = arith.constant 0 : i32
    %c0_i32_1 = arith.constant 0 : i32
    return %arg0, %c0_i32, %c0_i32_0 : i32, i32, i32
  }
}

</mosaic_0001>

<bundles_post_ra>
// kernel: tpu_custom_call.1
= control target key start
LH: loop header
LB: loop body
LE: loop exit
PB: predicated region body
PF: predicated region fallthrough
CT: control target
= control target key end

     0   :  { %7 = vsyncpa [#allocation3], 0  ;;  %s295_s0 = inlined_call_operand.hbm [shape: f32[8,2,128], index: 0, kind: input, shape index: {}]   ;;  %s296_s1 = inlined_call_operand.hbm [shape: f32[5000,1,128], index: 1, kind: input, shape index: {}]   ;;  %s297_s2 = inlined_call_operand.hbm [shape: f32[8,2,128], index: 2, kind: output, shape index: {}]  }
   0x1   :  { %8 = vsyncpa [#allocation6], 0 }
   0x2   :  { %9 = vsyncpa [#allocation4], 0  ;;  %s225_s9 = smov [#allocation2]   ;;  %s153_s13 = scalar_lea.hbm %s295_s0, 256 }
   0x3   :  { %s15_s10 = sshll.u32 %s225_s9, 4  ;;  %p154_p0 = scmp.ne.s32.totalorder %s295_s0, %s153_s13  ;;  %s16_s10 = int_to_ptr.vmem [resolvable:$true] %s15_s10 }
   0x4   :  { %p157_p1 = scmp.lt.u32.totalorder %s153_s13, %s295_s0 }
   0x6   :  { %p159_p2 = pnand %p157_p1, %p154_p0 }
   0x8   :  { %162 = shalt.err (!%p159_p2)
}
   0x9   :  { %s163_s18 = scalar_lea.vmem %s16_s10, 256  ;;  %p168_p4 = scmp.lt.s32.totalorder %s16_s10, %s16_s10 }
   0xa   :  { %p164_p3 = scmp.ne.s32.totalorder %s16_s10, %s163_s18  ;;  %p169_p5 = scmp.lt.s32.totalorder %s163_s18, %s163_s18 }
   0xc   :  { %p170_p6 = por %p169_p5, %p168_p4 }
   0xe   :  { %p171_p7 = pnand %p170_p6, %p164_p3 }
  0x10   :  { %174 = shalt.err (!%p171_p7)
}
  0x11   :  { %s226_s19 = smov 32   ;;  %s227_s20 = smov 2  }
  0x12   :  { %21 = dma.hbm_to_vmem [thread:$0]  %s295_s0, 256, %s16_s10, [#allocation3], %s226_s19, %s226_s19, %s227_s20  }
  0x13   :  { %s228_s23 = smov [#allocation5]   ;;  %s175_s27 = scalar_lea.hbm %s296_s1, 128 }
  0x14   :  { %s27_s24 = sshll.u32 %s228_s23, 4  ;;  %p176_p8 = scmp.ne.s32.totalorder %s296_s1, %s175_s27  ;;  %s28_s24 = int_to_ptr.vmem [resolvable:$true] %s27_s24 }
  0x15   :  { %s177_s4 = scalar_lea.hbm %s296_s1, 80000  ;;  %p179_p10 = scmp.lt.u32.totalorder %s175_s27, %s296_s1 }
  0x16   :  { %p178_p9 = scmp.lt.u32.totalorder %s177_s4, %s175_s27 }
  0x18   :  { %p180_p11 = por %p179_p10, %p178_p9 }
  0x1a   :  { %p181_p12 = pnand %p180_p11, %p176_p8 }
  0x1c   :  { %184 = shalt.err (!%p181_p12)
}
  0x1d   :  { %s185_s0 = scalar_lea.vmem %s28_s24, 128  ;;  %p190_p0 = scmp.lt.s32.totalorder %s28_s24, %s28_s24 }
  0x1e   :  { %p186_p13 = scmp.ne.s32.totalorder %s28_s24, %s185_s0  ;;  %p191_p1 = scmp.lt.s32.totalorder %s185_s0, %s185_s0 }
  0x20   :  { %p192_p2 = por %p191_p1, %p190_p0 }
  0x22   :  { %p193_p3 = pnand %p192_p2, %p186_p13 }
  0x24   :  { %196 = shalt.err (!%p193_p3)
}
  0x25   :  { %s229_s7 = smov 16   ;;  %s230_s8 = smov 1  }
  0x26   :  { %33 = dma.hbm_to_vmem [thread:$0]  %s296_s1, 128, %s28_s24, [#allocation6], %s229_s7, %s229_s7, %s230_s8  }
  0x27   :  { %219 = dma.done.wait [#allocation3], 256  }
  0x28   :  { %220 = vsyncadd [#allocation3], 4294967040 }
  0x29   :  { %221 = dma.done.wait [#allocation6], 128  }
  0x2a   :  { %222 = vsyncadd [#allocation6], 4294967168  ;;  %s231_s11 = smov [#allocation7]   ;;  %v40_v0 = vld [vmem:[#allocation2] sm:$0x3] }
  0x2b   :  { %s277_s12 = sshll.u32 %s231_s11, 4  ;;  %v138_v1 = vld [vmem:[#allocation5] ss:$0 sm:$0xff]  ;;  %v41_v2 = vld [vmem:[#allocation2 + $0x2] sm:$0x3]  ;;  %s126_s12 = int_to_ptr.vmem [resolvable:$true] %s277_s12 }
  0x2c   :  { %v104_v3 = vadd.f32 %v138_v1, %v40_v0  ;;  %v139_v4 = vld [vmem:[#allocation5 + $0x1] ss:$0 sm:$0xff]  ;;  %v42_v5 = vld [vmem:[#allocation2 + $0x4] sm:$0x3]  ;;  %v140_v6 = vld [vmem:[#allocation5 + $0x2] ss:$0 sm:$0xff]  ;;  %p202_p5 = scmp.lt.s32.totalorder %s126_s12, %s126_s12 }
  0x2d   :  { %v105_v7 = vadd.f32 %v139_v4, %v41_v2  ;;  %v106_v8 = vadd.f32 %v140_v6, %v42_v5  ;;  %v43_v9 = vld [vmem:[#allocation2 + $0x6] sm:$0x3]  ;;  %v141_v10 = vld [vmem:[#allocation5 + $0x3] ss:$0 sm:$0xff]  ;;  %v44_v11 = vld [vmem:[#allocation2 + $0x8] sm:$0x3] }
  0x2e   :  { %112 = vst [vmem:[#allocation7] sm:$0x3] %v104_v3  ;;  %v107_v12 = vadd.f32 %v141_v10, %v43_v9  ;;  %v142_v13 = vld [vmem:[#allocation5 + $0x4] ss:$0 sm:$0xff]  ;;  %v45_v14 = vld [vmem:[#allocation2 + $0xa] sm:$0x3] }
  0x2f   :  { %v143_v15 = vld [vmem:[#allocation5 + $0x5] ss:$0 sm:$0xff]  ;;  %113 = vst [vmem:[#allocation7 + $0x2] sm:$0x3] %v105_v7  ;;  %114 = vst [vmem:[#allocation7 + $0x4] sm:$0x3] %v106_v8  ;;  %v108_v16 = vadd.f32 %v142_v13, %v44_v11 }
  0x30   :  { %v109_v17 = vadd.f32 %v143_v15, %v45_v14  ;;  %v46_v18 = vld [vmem:[#allocation2 + $0xc] sm:$0x3]  ;;  %v144_v19 = vld [vmem:[#allocation5 + $0x6] ss:$0 sm:$0xff]  ;;  %v47_v20 = vld [vmem:[#allocation2 + $0xe] sm:$0x3] }
  0x31   :  { %115 = vst [vmem:[#allocation7 + $0x6] sm:$0x3] %v107_v12  ;;  %v110_v21 = vadd.f32 %v144_v19, %v46_v18  ;;  %v145_v22 = vld [vmem:[#allocation5 + $0x7] ss:$0 sm:$0xff]  ;;  %116 = vst [vmem:[#allocation7 + $0x8] sm:$0x3] %v108_v16 }
  0x32   :  { %117 = vst [vmem:[#allocation7 + $0xa] sm:$0x3] %v109_v17  ;;  %v111_v23 = vadd.f32 %v145_v22, %v47_v20  ;;  %s197_s1 = scalar_lea.vmem %s126_s12, 256 }
  0x33   :  { %118 = vst [vmem:[#allocation7 + $0xc] sm:$0x3] %v110_v21  ;;  %p198_p4 = scmp.ne.s32.totalorder %s126_s12, %s197_s1  ;;  %p203_p6 = scmp.lt.s32.totalorder %s197_s1, %s197_s1 }
  0x34   :  { %119 = vst [vmem:[#allocation7 + $0xe] sm:$0x3] %v111_v23 }
  0x35   :  { %p204_p7 = por %p203_p6, %p202_p5 }
  0x37   :  { %p205_p8 = pnand %p204_p7, %p198_p4 }
  0x39   :  { %208 = shalt.err (!%p205_p8)
}
  0x3a   :  { %s209_s15 = scalar_lea.hbm %s297_s2, 256 }
  0x3b   :  { %p210_p9 = scmp.ne.s32.totalorder %s297_s2, %s209_s15  ;;  %p213_p10 = scmp.lt.u32.totalorder %s209_s15, %s297_s2 }
  0x3d   :  { %p215_p11 = pnand %p213_p10, %p210_p9 }
  0x3f   :  { %218 = shalt.err (!%p215_p11)
}
  0x40   :  { %131 = dma.vmem_to_hbm [thread:$0]  %s126_s12, 256, %s297_s2, [#allocation4], %s226_s19, %s226_s19, %s227_s20  }
  0x41   :  { %223 = dma.done.wait [#allocation4], 256  }
  0x42   :  { %224 = vsyncadd [#allocation4], 4294967040 }
  0x43   :  { %135 = vsyncpa [#allocation3], 1 }
  0x44   :  { %136 = vsyncpa [#allocation6], 1 }
  0x45   :  { %137 = vsyncpa [#allocation4], 1 }

</bundles_post_ra>
